<compile_context>
chip_gen: v7x
topology: tpu7x:2x2x1
jax: 0.10.0
libtpu: 0.0.40
codegen_flags: <defaults>
</compile_context>

<pallas_src>
import functools

import jax
import jax.numpy as jnp
import numpy as np
from jax.experimental import pallas as pl
from jax.experimental.pallas import tpu as pltpu


# ---------------------------------------------------------------------------
# Helpers
# ---------------------------------------------------------------------------
def _halo_masks(N, T, batch_tile, dtype):
    """(9, batch_tile*N*T) validity masks for the 9 (dy, dx) halo shifts.

    Row index = (dy+1)*3 + (dx+1).  mask[..., b*N*T + n*T + t] == 1 iff
    (n+dy, t+dx) is in-bounds.  Every cross-row / cross-batch leak produced by
    a linear lane shift is exactly a masked position.
    """
    n_idx = np.repeat(np.arange(N), T)
    t_idx = np.tile(np.arange(T), N)
    m = np.zeros((9, N * T), dtype=np.float32)
    for dy in (-1, 0, 1):
        for dx in (-1, 0, 1):
            valid = ((n_idx + dy >= 0) & (n_idx + dy < N) &
                     (t_idx + dx >= 0) & (t_idx + dx < T))
            m[(dy + 1) * 3 + (dx + 1)] = valid
    m = np.tile(m, (1, batch_tile))          # same mask for every batch slab
    return m.astype(dtype)


def _prep_weight(w):
    """OIHW conv weight -> (O, kh*kw*I) im2col tile, (ky, kx) outer / i inner."""
    o, i, kh, kw = w.shape
    return jnp.transpose(w, (0, 2, 3, 1)).reshape(o, kh * kw * i)


def _pack_weights(params, pc, dtype):
    """Block-diagonal (3*pc, 15*pc + 1) weight; last column holds the biases.

    Rows [0,pc): ST (3x3);  [pc,2pc): S (3x1);  [2pc,3pc): T (1x3).
    Columns [0,9pc) / [9pc,12pc) / [12pc,15pc) are the per-branch im2col
    blocks; column 15pc is the bias (matched by a ones-row in the patches).
    """
    w = jnp.zeros((3 * pc, 15 * pc + 1), dtype)
    w = w.at[0 * pc:1 * pc, 0 * pc:9 * pc].set(_prep_weight(params["w_st"]).astype(dtype))
    w = w.at[1 * pc:2 * pc, 9 * pc:12 * pc].set(_prep_weight(params["w_s"]).astype(dtype))
    w = w.at[2 * pc:3 * pc, 12 * pc:15 * pc].set(_prep_weight(params["w_t"]).astype(dtype))
    w = w.at[0 * pc:1 * pc, 15 * pc].set(params["b_st"].astype(dtype))
    w = w.at[1 * pc:2 * pc, 15 * pc].set(params["b_s"].astype(dtype))
    w = w.at[2 * pc:3 * pc, 15 * pc].set(params["b_t"].astype(dtype))
    return w


# ---------------------------------------------------------------------------
# Pallas kernel
# ---------------------------------------------------------------------------
def _make_joint_conv_kernel(C, N, T, pc, groups, batch_tile, dtype):
    M = N * T
    BM = batch_tile * M
    c_id = C - 3 * pc
    cpg = C // groups

    def kernel(x_ref, mask_ref, w_ref, o_ref):
        # x_ref   : (batch_tile, C, M)   lane-dense input block
        # mask_ref: (9, BM)              halo validity masks (tiled over batch)
        # w_ref   : (3*pc, 15*pc + 1)    packed block-diag weight + bias column
        # o_ref   : (batch_tile, C, M)   lane-dense output block
        masks = mask_ref[...]

        # Load the whole input block once (small), slice values from here on.
        xbs = [x_ref[b] for b in range(batch_tile)]          # each (C, M)

        def gather(ch0):
            # (pc, BM): channel block of every batch, batches concatenated
            # along the lane axis (register work only, no HBM traffic).
            return jnp.concatenate(
                [xb[ch0:ch0 + pc, :] for xb in xbs], axis=1)

        x_st = gather(c_id)
        x_s = gather(c_id + pc)
        x_t = gather(c_id + 2 * pc)

        def shifted(xc, dy, dx):
            # shifted[:, b*M + n*T + t] = xc[:, b*M + (n+dy)*T + (t+dx)]
            # if (n+dy, t+dx) is in range, else 0.  Linear lane shift + mask;
            # cross-row / cross-batch leaks are exactly the masked positions.
            s = dy * T + dx
            if s == 0:
                return xc                                    # no mask needed
            if s > 0:
                raw = jnp.concatenate(
                    [xc[:, s:], jnp.zeros((pc, s), xc.dtype)], axis=1)
            else:
                raw = jnp.concatenate(
                    [jnp.zeros((pc, -s), xc.dtype), xc[:, :BM + s]], axis=1)
            r = (dy + 1) * 3 + (dx + 1)
            return raw * masks[r:r + 1, :]

        # One im2col patch matrix covering all three branches and all batches.
        slabs = []
        for ky in range(3):                                  # ST: 3x3, pad (1,1)
            for kx in range(3):
                slabs.append(shifted(x_st, ky - 1, kx - 1))
        for ky in range(3):                                  # S : 3x1, pad (1,0)
            slabs.append(shifted(x_s, ky - 1, 0))
        for kx in range(3):                                  # T : 1x3, pad (0,1)
            slabs.append(shifted(x_t, 0, kx - 1))
        slabs.append(jnp.ones((1, BM), dtype))               # bias ones-row
        patches = jnp.concatenate(slabs, axis=0)             # (15*pc+1, BM)

        # ONE MXU matmul for all branches & batches; f32 accumulate; bias
        # folded in via the ones-row / bias-column.
        y = jnp.dot(w_ref[...], patches,
                    preferred_element_type=jnp.float32)      # (3*pc, BM)
        y = y.astype(dtype)

        # Assemble the channel-shuffled output block in registers; one
        # full-width (C, M) store per batch (no per-row masked stores).
        for b in range(batch_tile):
            rows = []
            for d in range(C):
                src = (d % groups) * cpg + (d // groups)     # pre-shuffle channel
                if src < c_id:                               # identity passthrough
                    rows.append(xbs[b][src:src + 1, :])
                else:                                        # conv output row
                    k = src - c_id
                    rows.append(y[k:k + 1, b * M:(b + 1) * M])
            o_ref[b, :, :] = jnp.concatenate(rows, axis=0)   # (C, M) full store

    return kernel


# ---------------------------------------------------------------------------
# Wrapper
# ---------------------------------------------------------------------------
@functools.partial(jax.jit, static_argnames=("partial_", "batch_tile"))
def joint_conv_forward(x, params, partial_, batch_tile=None):
    b, c, n, t = x.shape
    # pc computed exactly as the PyTorch module does:
    #   pc = int(in_channels * (1 / partial))
    pc = int(c * (1 / partial_))
    c_id = c - 3 * pc
    assert c_id >= 0 and c % partial_ == 0
    m = n * t

    if batch_tile is None:
        # Whole batch in one grid step: blocks are tiny (~32 KiB), so a single
        # step avoids per-step pipeline overhead.  At production shapes, pick
        # batch_tile so the grid has >=4 steps and blocks fit scoped VMEM.
        batch_tile = b
    assert b % batch_tile == 0
    grid = (b // batch_tile,)

    x2 = x.reshape(b, c, m)                       # free reshape -> lane-dense
    masks = jnp.asarray(_halo_masks(n, t, batch_tile, x.dtype))
    w_packed = _pack_weights(params, pc, x.dtype)  # single packed operand

    kernel = _make_joint_conv_kernel(c, n, t, pc, partial_, batch_tile, x.dtype)

    out2 = pl.pallas_call(
        kernel,
        out_shape=jax.ShapeDtypeStruct((b, c, m), x.dtype),
        grid=grid,
        in_specs=[
            pl.BlockSpec((batch_tile, c, m), lambda i: (i, 0, 0)),
            pl.BlockSpec(masks.shape, lambda i: (0, 0)),
            pl.BlockSpec(w_packed.shape, lambda i: (0, 0)),
        ],
        out_specs=pl.BlockSpec((batch_tile, c, m), lambda i: (i, 0, 0)),
        # Single-TC on purpose: at these sizes a cross-core split only adds
        # sync/DMA overhead (use CORE_PARALLEL only at much larger blocks).
        compiler_params=pltpu.CompilerParams(
            dimension_semantics=("arbitrary",)),
    )(x2, masks, w_packed)

    return out2.reshape(b, c, n, t)               # free reshape back to NCHW


# ---------------------------------------------------------------------------
# Pure-JAX reference (for correctness check)
# ---------------------------------------------------------------------------
def channel_shuffle_ref(x, groups):
    b, c, n, t = x.shape
    cpg = c // groups
    return (x.reshape(b, groups, cpg, n, t)
             .transpose(0, 2, 1, 3, 4)
             .reshape(b, c, n, t))


def joint_conv_reference(x, params, partial_):
    c = x.shape[1]
    pc = int(c * (1 / partial_))
    c_id = c - 3 * pc
    x_id = x[:, :c_id]
    x_st = x[:, c_id:c_id + pc]
    x_s = x[:, c_id + pc:c_id + 2 * pc]
    x_t = x[:, c_id + 2 * pc:]

    def conv(xa, w, bias, pad):
        y = jax.lax.conv_general_dilated(
            xa, w, window_strides=(1, 1), padding=pad,
            dimension_numbers=("NCHW", "OIHW", "NCHW"))
        return y + bias[None, :, None, None]

    y_st = conv(x_st, params["w_st"], params["b_st"], ((1, 1), (1, 1)))
    y_s = conv(x_s, params["w_s"], params["b_s"], ((1, 1), (0, 0)))
    y_t = conv(x_t, params["w_t"], params["b_t"], ((0, 0), (1, 1)))
    out = jnp.concatenate([x_id, y_st, y_s, y_t], axis=1)
    return channel_shuffle_ref(out, partial_)


# ---------------------------------------------------------------------------
if __name__ == "__main__":
    # Small shapes consistent with the module: x is (B, C, N, T)
    B, C, N, T = 2, 16, 16, 16
    PARTIAL = 4
    PC = int(C * (1 / PARTIAL))  # = 4

    key = jax.random.PRNGKey(0)
    kx, k1, k2, k3, k4, k5, k6 = jax.random.split(key, 7)

    x = jax.random.normal(kx, (B, C, N, T), dtype=jnp.float32)

    # Deterministic synthetic parameters (shapes from the module's __init__)
    params = {
        "w_st": 0.1 * jax.random.normal(k1, (PC, PC, 3, 3), dtype=jnp.float32),
        "b_st": 0.1 * jax.random.normal(k2, (PC,), dtype=jnp.float32),
        "w_s":  0.1 * jax.random.normal(k3, (PC, PC, 3, 1), dtype=jnp.float32),
        "b_s":  0.1 * jax.random.normal(k4, (PC,), dtype=jnp.float32),
        "w_t":  0.1 * jax.random.normal(k5, (PC, PC, 1, 3), dtype=jnp.float32),
        "b_t":  0.1 * jax.random.normal(k6, (PC,), dtype=jnp.float32),
    }

    out = joint_conv_forward(x, params, PARTIAL)
    out = jax.block_until_ready(out)

    ref = jax.block_until_ready(joint_conv_reference(x, params, PARTIAL))
    np.testing.assert_allclose(np.asarray(out), np.asarray(ref),
                               rtol=1e-5, atol=1e-4)

    print("KERNEL_OK")
</pallas_src>

<mosaic_0001>
module attributes {stable_mosaic.version = 11 : i64} {
  func.func @kernel(%arg0: i32, %arg1: memref<2x16x256xf32, #tpu.memory_space<vmem>>, %arg2: memref<9x512xf32, #tpu.memory_space<vmem>>, %arg3: memref<12x61xf32, #tpu.memory_space<vmem>>, %arg4: memref<2x16x256xf32, #tpu.memory_space<vmem>>) attributes {dimension_semantics = [#tpu.dimension_semantics<arbitrary>], iteration_bounds = array<i64: 1>, scalar_prefetch = 0 : i64, scratch_operands = 0 : i64, tpu.core_type = #tpu.core_type<tc>, window_params = [{transform_indices = @transform_0, window_bounds = array<i64: 2, 16, 256>}, {pipeline_mode = #tpu.pipeline_mode<synchronous>, transform_indices = @transform_1, window_bounds = array<i64: 9, 512>}, {pipeline_mode = #tpu.pipeline_mode<synchronous>, transform_indices = @transform_2, window_bounds = array<i64: 12, 61>}, {transform_indices = @transform_3, window_bounds = array<i64: 2, 16, 256>}]} {
    %c0 = arith.constant 0 : index
    %c0_0 = arith.constant 0 : index
    %0 = vector.load %arg2[%c0, %c0_0] : memref<9x512xf32, #tpu.memory_space<vmem>>, vector<9x512xf32>
    %c0_1 = arith.constant 0 : index
    %c0_2 = arith.constant 0 : index
    %c0_3 = arith.constant 0 : index
    %1 = vector.load %arg1[%c0_1, %c0_2, %c0_3] : memref<2x16x256xf32, #tpu.memory_space<vmem>>, vector<1x16x256xf32>
    %2 = vector.shape_cast %1 : vector<1x16x256xf32> to vector<16x256xf32>
    %c1 = arith.constant 1 : index
    %c0_4 = arith.constant 0 : index
    %c0_5 = arith.constant 0 : index
    %3 = vector.load %arg1[%c1, %c0_4, %c0_5] : memref<2x16x256xf32, #tpu.memory_space<vmem>>, vector<1x16x256xf32>
    %4 = vector.shape_cast %3 : vector<1x16x256xf32> to vector<16x256xf32>
    %5 = vector.extract_strided_slice %2 {offsets = [4, 0], sizes = [4, 256], strides = [1, 1]} : vector<16x256xf32> to vector<4x256xf32>
    %6 = vector.extract_strided_slice %4 {offsets = [4, 0], sizes = [4, 256], strides = [1, 1]} : vector<16x256xf32> to vector<4x256xf32>
    %7 = tpu.concatenate %5, %6 in 1 : vector<4x256xf32>, vector<4x256xf32> -> vector<4x512xf32>
    %8 = vector.extract_strided_slice %2 {offsets = [8, 0], sizes = [4, 256], strides = [1, 1]} : vector<16x256xf32> to vector<4x256xf32>
    %9 = vector.extract_strided_slice %4 {offsets = [8, 0], sizes = [4, 256], strides = [1, 1]} : vector<16x256xf32> to vector<4x256xf32>
    %10 = tpu.concatenate %8, %9 in 1 : vector<4x256xf32>, vector<4x256xf32> -> vector<4x512xf32>
    %11 = vector.extract_strided_slice %2 {offsets = [12, 0], sizes = [4, 256], strides = [1, 1]} : vector<16x256xf32> to vector<4x256xf32>
    %12 = vector.extract_strided_slice %4 {offsets = [12, 0], sizes = [4, 256], strides = [1, 1]} : vector<16x256xf32> to vector<4x256xf32>
    %13 = tpu.concatenate %11, %12 in 1 : vector<4x256xf32>, vector<4x256xf32> -> vector<4x512xf32>
    %cst = arith.constant 0.000000e+00 : f32
    %14 = vector.broadcast %cst : f32 to vector<4x17xf32>
    %15 = vector.extract_strided_slice %7 {offsets = [0, 0], sizes = [4, 495], strides = [1, 1]} : vector<4x512xf32> to vector<4x495xf32>
    %16 = tpu.concatenate %14, %15 in 1 : vector<4x17xf32>, vector<4x495xf32> -> vector<4x512xf32>
    %17 = vector.extract_strided_slice %0 {offsets = [0, 0], sizes = [1, 512], strides = [1, 1]} : vector<9x512xf32> to vector<1x512xf32>
    %18 = vector.broadcast %17 : vector<1x512xf32> to vector<4x512xf32>
    %19 = arith.mulf %16, %18 : vector<4x512xf32>
    %cst_6 = arith.constant 0.000000e+00 : f32
    %20 = vector.broadcast %cst_6 : f32 to vector<4x16xf32>
    %21 = vector.extract_strided_slice %7 {offsets = [0, 0], sizes = [4, 496], strides = [1, 1]} : vector<4x512xf32> to vector<4x496xf32>
    %22 = tpu.concatenate %20, %21 in 1 : vector<4x16xf32>, vector<4x496xf32> -> vector<4x512xf32>
    %23 = vector.extract_strided_slice %0 {offsets = [1, 0], sizes = [1, 512], strides = [1, 1]} : vector<9x512xf32> to vector<1x512xf32>
    %24 = vector.broadcast %23 : vector<1x512xf32> to vector<4x512xf32>
    %25 = arith.mulf %22, %24 : vector<4x512xf32>
    %cst_7 = arith.constant 0.000000e+00 : f32
    %26 = vector.broadcast %cst_7 : f32 to vector<4x15xf32>
    %27 = vector.extract_strided_slice %7 {offsets = [0, 0], sizes = [4, 497], strides = [1, 1]} : vector<4x512xf32> to vector<4x497xf32>
    %28 = tpu.concatenate %26, %27 in 1 : vector<4x15xf32>, vector<4x497xf32> -> vector<4x512xf32>
    %29 = vector.extract_strided_slice %0 {offsets = [2, 0], sizes = [1, 512], strides = [1, 1]} : vector<9x512xf32> to vector<1x512xf32>
    %30 = vector.broadcast %29 : vector<1x512xf32> to vector<4x512xf32>
    %31 = arith.mulf %28, %30 : vector<4x512xf32>
    %cst_8 = arith.constant 0.000000e+00 : f32
    %32 = vector.broadcast %cst_8 : f32 to vector<4x1xf32>
    %33 = vector.extract_strided_slice %7 {offsets = [0, 0], sizes = [4, 511], strides = [1, 1]} : vector<4x512xf32> to vector<4x511xf32>
    %34 = tpu.concatenate %32, %33 in 1 : vector<4x1xf32>, vector<4x511xf32> -> vector<4x512xf32>
    %35 = vector.extract_strided_slice %0 {offsets = [3, 0], sizes = [1, 512], strides = [1, 1]} : vector<9x512xf32> to vector<1x512xf32>
    %36 = vector.broadcast %35 : vector<1x512xf32> to vector<4x512xf32>
    %37 = arith.mulf %34, %36 : vector<4x512xf32>
    %38 = vector.extract_strided_slice %7 {offsets = [0, 1], sizes = [4, 511], strides = [1, 1]} : vector<4x512xf32> to vector<4x511xf32>
    %cst_9 = arith.constant 0.000000e+00 : f32
    %39 = vector.broadcast %cst_9 : f32 to vector<4x1xf32>
    %40 = tpu.concatenate %38, %39 in 1 : vector<4x511xf32>, vector<4x1xf32> -> vector<4x512xf32>
    %41 = vector.extract_strided_slice %0 {offsets = [5, 0], sizes = [1, 512], strides = [1, 1]} : vector<9x512xf32> to vector<1x512xf32>
    %42 = vector.broadcast %41 : vector<1x512xf32> to vector<4x512xf32>
    %43 = arith.mulf %40, %42 : vector<4x512xf32>
    %44 = vector.extract_strided_slice %7 {offsets = [0, 15], sizes = [4, 497], strides = [1, 1]} : vector<4x512xf32> to vector<4x497xf32>
    %cst_10 = arith.constant 0.000000e+00 : f32
    %45 = vector.broadcast %cst_10 : f32 to vector<4x15xf32>
    %46 = tpu.concatenate %44, %45 in 1 : vector<4x497xf32>, vector<4x15xf32> -> vector<4x512xf32>
    %47 = vector.extract_strided_slice %0 {offsets = [6, 0], sizes = [1, 512], strides = [1, 1]} : vector<9x512xf32> to vector<1x512xf32>
    %48 = vector.broadcast %47 : vector<1x512xf32> to vector<4x512xf32>
    %49 = arith.mulf %46, %48 : vector<4x512xf32>
    %50 = vector.extract_strided_slice %7 {offsets = [0, 16], sizes = [4, 496], strides = [1, 1]} : vector<4x512xf32> to vector<4x496xf32>
    %cst_11 = arith.constant 0.000000e+00 : f32
    %51 = vector.broadcast %cst_11 : f32 to vector<4x16xf32>
    %52 = tpu.concatenate %50, %51 in 1 : vector<4x496xf32>, vector<4x16xf32> -> vector<4x512xf32>
    %53 = vector.extract_strided_slice %0 {offsets = [7, 0], sizes = [1, 512], strides = [1, 1]} : vector<9x512xf32> to vector<1x512xf32>
    %54 = vector.broadcast %53 : vector<1x512xf32> to vector<4x512xf32>
    %55 = arith.mulf %52, %54 : vector<4x512xf32>
    %56 = vector.extract_strided_slice %7 {offsets = [0, 17], sizes = [4, 495], strides = [1, 1]} : vector<4x512xf32> to vector<4x495xf32>
    %cst_12 = arith.constant 0.000000e+00 : f32
    %57 = vector.broadcast %cst_12 : f32 to vector<4x17xf32>
    %58 = tpu.concatenate %56, %57 in 1 : vector<4x495xf32>, vector<4x17xf32> -> vector<4x512xf32>
    %59 = vector.extract_strided_slice %0 {offsets = [8, 0], sizes = [1, 512], strides = [1, 1]} : vector<9x512xf32> to vector<1x512xf32>
    %60 = vector.broadcast %59 : vector<1x512xf32> to vector<4x512xf32>
    %61 = arith.mulf %58, %60 : vector<4x512xf32>
    %cst_13 = arith.constant 0.000000e+00 : f32
    %62 = vector.broadcast %cst_13 : f32 to vector<4x16xf32>
    %63 = vector.extract_strided_slice %10 {offsets = [0, 0], sizes = [4, 496], strides = [1, 1]} : vector<4x512xf32> to vector<4x496xf32>
    %64 = tpu.concatenate %62, %63 in 1 : vector<4x16xf32>, vector<4x496xf32> -> vector<4x512xf32>
    %65 = vector.extract_strided_slice %0 {offsets = [1, 0], sizes = [1, 512], strides = [1, 1]} : vector<9x512xf32> to vector<1x512xf32>
    %66 = vector.broadcast %65 : vector<1x512xf32> to vector<4x512xf32>
    %67 = arith.mulf %64, %66 : vector<4x512xf32>
    %68 = vector.extract_strided_slice %10 {offsets = [0, 16], sizes = [4, 496], strides = [1, 1]} : vector<4x512xf32> to vector<4x496xf32>
    %cst_14 = arith.constant 0.000000e+00 : f32
    %69 = vector.broadcast %cst_14 : f32 to vector<4x16xf32>
    %70 = tpu.concatenate %68, %69 in 1 : vector<4x496xf32>, vector<4x16xf32> -> vector<4x512xf32>
    %71 = vector.extract_strided_slice %0 {offsets = [7, 0], sizes = [1, 512], strides = [1, 1]} : vector<9x512xf32> to vector<1x512xf32>
    %72 = vector.broadcast %71 : vector<1x512xf32> to vector<4x512xf32>
    %73 = arith.mulf %70, %72 : vector<4x512xf32>
    %cst_15 = arith.constant 0.000000e+00 : f32
    %74 = vector.broadcast %cst_15 : f32 to vector<4x1xf32>
    %75 = vector.extract_strided_slice %13 {offsets = [0, 0], sizes = [4, 511], strides = [1, 1]} : vector<4x512xf32> to vector<4x511xf32>
    %76 = tpu.concatenate %74, %75 in 1 : vector<4x1xf32>, vector<4x511xf32> -> vector<4x512xf32>
    %77 = vector.extract_strided_slice %0 {offsets = [3, 0], sizes = [1, 512], strides = [1, 1]} : vector<9x512xf32> to vector<1x512xf32>
    %78 = vector.broadcast %77 : vector<1x512xf32> to vector<4x512xf32>
    %79 = arith.mulf %76, %78 : vector<4x512xf32>
    %80 = vector.extract_strided_slice %13 {offsets = [0, 1], sizes = [4, 511], strides = [1, 1]} : vector<4x512xf32> to vector<4x511xf32>
    %cst_16 = arith.constant 0.000000e+00 : f32
    %81 = vector.broadcast %cst_16 : f32 to vector<4x1xf32>
    %82 = tpu.concatenate %80, %81 in 1 : vector<4x511xf32>, vector<4x1xf32> -> vector<4x512xf32>
    %83 = vector.extract_strided_slice %0 {offsets = [5, 0], sizes = [1, 512], strides = [1, 1]} : vector<9x512xf32> to vector<1x512xf32>
    %84 = vector.broadcast %83 : vector<1x512xf32> to vector<4x512xf32>
    %85 = arith.mulf %82, %84 : vector<4x512xf32>
    %cst_17 = arith.constant 1.000000e+00 : f32
    %86 = vector.broadcast %cst_17 : f32 to vector<1x512xf32>
    %87 = tpu.concatenate %19, %25, %31, %37, %7, %43, %49, %55, %61, %67, %10, %73, %79, %13, %85, %86 in 0 : vector<4x512xf32>, vector<4x512xf32>, vector<4x512xf32>, vector<4x512xf32>, vector<4x512xf32>, vector<4x512xf32>, vector<4x512xf32>, vector<4x512xf32>, vector<4x512xf32>, vector<4x512xf32>, vector<4x512xf32>, vector<4x512xf32>, vector<4x512xf32>, vector<4x512xf32>, vector<4x512xf32>, vector<1x512xf32> -> vector<61x512xf32>
    %c0_18 = arith.constant 0 : index
    %c0_19 = arith.constant 0 : index
    %88 = vector.load %arg3[%c0_18, %c0_19] : memref<12x61xf32, #tpu.memory_space<vmem>>, vector<12x61xf32>
    %cst_20 = arith.constant dense<0.000000e+00> : vector<12x512xf32>
    %89 = tpu.matmul %88, %87, %cst_20 {dimension_numbers = #tpu.dot_dimension_numbers<[1], [0], [0], [1], [0, 0, 1, 1], [], []>} : vector<12x61xf32>, vector<61x512xf32>, vector<12x512xf32> -> vector<12x512xf32>
    %90 = vector.extract_strided_slice %2 {offsets = [0, 0], sizes = [1, 256], strides = [1, 1]} : vector<16x256xf32> to vector<1x256xf32>
    %91 = vector.extract_strided_slice %89 {offsets = [0, 0], sizes = [1, 256], strides = [1, 1]} : vector<12x512xf32> to vector<1x256xf32>
    %92 = vector.extract_strided_slice %89 {offsets = [4, 0], sizes = [1, 256], strides = [1, 1]} : vector<12x512xf32> to vector<1x256xf32>
    %93 = vector.extract_strided_slice %89 {offsets = [8, 0], sizes = [1, 256], strides = [1, 1]} : vector<12x512xf32> to vector<1x256xf32>
    %94 = vector.extract_strided_slice %2 {offsets = [1, 0], sizes = [1, 256], strides = [1, 1]} : vector<16x256xf32> to vector<1x256xf32>
    %95 = vector.extract_strided_slice %89 {offsets = [1, 0], sizes = [1, 256], strides = [1, 1]} : vector<12x512xf32> to vector<1x256xf32>
    %96 = vector.extract_strided_slice %89 {offsets = [5, 0], sizes = [1, 256], strides = [1, 1]} : vector<12x512xf32> to vector<1x256xf32>
    %97 = vector.extract_strided_slice %89 {offsets = [9, 0], sizes = [1, 256], strides = [1, 1]} : vector<12x512xf32> to vector<1x256xf32>
    %98 = vector.extract_strided_slice %2 {offsets = [2, 0], sizes = [1, 256], strides = [1, 1]} : vector<16x256xf32> to vector<1x256xf32>
    %99 = vector.extract_strided_slice %89 {offsets = [2, 0], sizes = [1, 256], strides = [1, 1]} : vector<12x512xf32> to vector<1x256xf32>
    %100 = vector.extract_strided_slice %89 {offsets = [6, 0], sizes = [1, 256], strides = [1, 1]} : vector<12x512xf32> to vector<1x256xf32>
    %101 = vector.extract_strided_slice %89 {offsets = [10, 0], sizes = [1, 256], strides = [1, 1]} : vector<12x512xf32> to vector<1x256xf32>
    %102 = vector.extract_strided_slice %2 {offsets = [3, 0], sizes = [1, 256], strides = [1, 1]} : vector<16x256xf32> to vector<1x256xf32>
    %103 = vector.extract_strided_slice %89 {offsets = [3, 0], sizes = [1, 256], strides = [1, 1]} : vector<12x512xf32> to vector<1x256xf32>
    %104 = vector.extract_strided_slice %89 {offsets = [7, 0], sizes = [1, 256], strides = [1, 1]} : vector<12x512xf32> to vector<1x256xf32>
    %105 = vector.extract_strided_slice %89 {offsets = [11, 0], sizes = [1, 256], strides = [1, 1]} : vector<12x512xf32> to vector<1x256xf32>
    %106 = tpu.concatenate %90, %91, %92, %93, %94, %95, %96, %97, %98, %99, %100, %101, %102, %103, %104, %105 in 0 : vector<1x256xf32>, vector<1x256xf32>, vector<1x256xf32>, vector<1x256xf32>, vector<1x256xf32>, vector<1x256xf32>, vector<1x256xf32>, vector<1x256xf32>, vector<1x256xf32>, vector<1x256xf32>, vector<1x256xf32>, vector<1x256xf32>, vector<1x256xf32>, vector<1x256xf32>, vector<1x256xf32>, vector<1x256xf32> -> vector<16x256xf32>
    %c0_21 = arith.constant 0 : index
    %c0_22 = arith.constant 0 : index
    %c0_23 = arith.constant 0 : index
    %107 = vector.load %arg4[%c0_21, %c0_22, %c0_23] : memref<2x16x256xf32, #tpu.memory_space<vmem>>, vector<1x16x256xf32>
    %108 = vector.shape_cast %107 : vector<1x16x256xf32> to vector<16x256xf32>
    %109 = vector.shape_cast %106 : vector<16x256xf32> to vector<1x16x256xf32>
    tpu.vector_store %arg4[%c0_21, %c0_22, %c0_23], %109 {strides = array<i32>} : memref<2x16x256xf32, #tpu.memory_space<vmem>>, vector<1x16x256xf32>,
    %110 = vector.extract_strided_slice %4 {offsets = [0, 0], sizes = [1, 256], strides = [1, 1]} : vector<16x256xf32> to vector<1x256xf32>
    %111 = vector.extract_strided_slice %89 {offsets = [0, 256], sizes = [1, 256], strides = [1, 1]} : vector<12x512xf32> to vector<1x256xf32>
    %112 = vector.extract_strided_slice %89 {offsets = [4, 256], sizes = [1, 256], strides = [1, 1]} : vector<12x512xf32> to vector<1x256xf32>
    %113 = vector.extract_strided_slice %89 {offsets = [8, 256], sizes = [1, 256], strides = [1, 1]} : vector<12x512xf32> to vector<1x256xf32>
    %114 = vector.extract_strided_slice %4 {offsets = [1, 0], sizes = [1, 256], strides = [1, 1]} : vector<16x256xf32> to vector<1x256xf32>
    %115 = vector.extract_strided_slice %89 {offsets = [1, 256], sizes = [1, 256], strides = [1, 1]} : vector<12x512xf32> to vector<1x256xf32>
    %116 = vector.extract_strided_slice %89 {offsets = [5, 256], sizes = [1, 256], strides = [1, 1]} : vector<12x512xf32> to vector<1x256xf32>
    %117 = vector.extract_strided_slice %89 {offsets = [9, 256], sizes = [1, 256], strides = [1, 1]} : vector<12x512xf32> to vector<1x256xf32>
    %118 = vector.extract_strided_slice %4 {offsets = [2, 0], sizes = [1, 256], strides = [1, 1]} : vector<16x256xf32> to vector<1x256xf32>
    %119 = vector.extract_strided_slice %89 {offsets = [2, 256], sizes = [1, 256], strides = [1, 1]} : vector<12x512xf32> to vector<1x256xf32>
    %120 = vector.extract_strided_slice %89 {offsets = [6, 256], sizes = [1, 256], strides = [1, 1]} : vector<12x512xf32> to vector<1x256xf32>
    %121 = vector.extract_strided_slice %89 {offsets = [10, 256], sizes = [1, 256], strides = [1, 1]} : vector<12x512xf32> to vector<1x256xf32>
    %122 = vector.extract_strided_slice %4 {offsets = [3, 0], sizes = [1, 256], strides = [1, 1]} : vector<16x256xf32> to vector<1x256xf32>
    %123 = vector.extract_strided_slice %89 {offsets = [3, 256], sizes = [1, 256], strides = [1, 1]} : vector<12x512xf32> to vector<1x256xf32>
    %124 = vector.extract_strided_slice %89 {offsets = [7, 256], sizes = [1, 256], strides = [1, 1]} : vector<12x512xf32> to vector<1x256xf32>
    %125 = vector.extract_strided_slice %89 {offsets = [11, 256], sizes = [1, 256], strides = [1, 1]} : vector<12x512xf32> to vector<1x256xf32>
    %126 = tpu.concatenate %110, %111, %112, %113, %114, %115, %116, %117, %118, %119, %120, %121, %122, %123, %124, %125 in 0 : vector<1x256xf32>, vector<1x256xf32>, vector<1x256xf32>, vector<1x256xf32>, vector<1x256xf32>, vector<1x256xf32>, vector<1x256xf32>, vector<1x256xf32>, vector<1x256xf32>, vector<1x256xf32>, vector<1x256xf32>, vector<1x256xf32>, vector<1x256xf32>, vector<1x256xf32>, vector<1x256xf32>, vector<1x256xf32> -> vector<16x256xf32>
    %c1_24 = arith.constant 1 : index
    %c0_25 = arith.constant 0 : index
    %c0_26 = arith.constant 0 : index
    %127 = vector.load %arg4[%c1_24, %c0_25, %c0_26] : memref<2x16x256xf32, #tpu.memory_space<vmem>>, vector<1x16x256xf32>
    %128 = vector.shape_cast %127 : vector<1x16x256xf32> to vector<16x256xf32>
    %129 = vector.shape_cast %126 : vector<16x256xf32> to vector<1x16x256xf32>
    tpu.vector_store %arg4[%c1_24, %c0_25, %c0_26], %129 {strides = array<i32>} : memref<2x16x256xf32, #tpu.memory_space<vmem>>, vector<1x16x256xf32>,
    return
  }
  func.func @transform_0(%arg0: i32) -> (i32, i32, i32) {
    %c0_i32 = arith.constant 0 : i32
    %c0_i32_0 = arith.constant 0 : i32
    %c0_i32_1 = arith.constant 0 : i32
    return %arg0, %c0_i32, %c0_i32_0 : i32, i32, i32
  }
  func.func @transform_1(%arg0: i32) -> (i32, i32) {
    %c0_i32 = arith.constant 0 : i32
    %c0_i32_0 = arith.constant 0 : i32
    %c0_i32_1 = arith.constant 0 : i32
    return %c0_i32, %c0_i32_0 : i32, i32
  }
  func.func @transform_2(%arg0: i32) -> (i32, i32) {
    %c0_i32 = arith.constant 0 : i32
    %c0_i32_0 = arith.constant 0 : i32
    %c0_i32_1 = arith.constant 0 : i32
    return %c0_i32, %c0_i32_0 : i32, i32
  }
  func.func @transform_3(%arg0: i32) -> (i32, i32, i32) {
    %c0_i32 = arith.constant 0 : i32
    %c0_i32_0 = arith.constant 0 : i32
    %c0_i32_1 = arith.constant 0 : i32
    return %arg0, %c0_i32, %c0_i32_0 : i32, i32, i32
  }
}

</mosaic_0001>

<bundles_post_ra>
// kernel: joint_conv_forward.1
= control target key start
LH: loop header
LB: loop body
LE: loop exit
PB: predicated region body
PF: predicated region fallthrough
CT: control target
= control target key end

     0   :  { %s964_s20 = smov 16   ;;  %s965_s21 = smov 1   ;;  %v972_v14 = vmov 0.0   ;;  %v56_v19 = vlaneseq  ;;  %vm84_vm0 = vcmask 130048   ;;  %vm158_vm1 = vcmask 7168   ;;  %s1501_s0 = inlined_call_operand.vmem [shape: f32[2,16,256], index: 0, kind: input, shape index: {}]   ;;  %s1502_s1 = inlined_call_operand.vmem [shape: f32[9,512], index: 1, kind: input, shape index: {}]   ;;  %s1503_s2 = inlined_call_operand.vmem [shape: f32[12,61], index: 2, kind: input, shape index: {}]   ;;  %s1504_s3 = inlined_call_operand.vmem [shape: f32[2,16,256], index: 3, kind: output, shape index: {}]  }
   0x1   :  { %v997_v0 = vld [vmem:[%s1501_s0 + $0x20] sm:$0xff]  ;;  %v1007_v2 = vld [vmem:[%s1501_s0 + $0x28] sm:$0xff]  ;;  %s966_s22 = smov 17   ;;  %s967_s23 = smov 15   ;;  %v1067_v8 = vld [vmem:[%s1501_s0 + $0x10] sm:$0xff]  ;;  %630 = vmatprep.mubr.f32.mxu0 %v972_v14  ;;  %707 = vmatprep.mubr.f32.mxu1 %v972_v14  ;;  %vm47_vm2 = vcmask 138240  }
   0x2   :  { %v1002_v1 = vld [vmem:[%s1501_s0] sm:$0xff]  ;;  %v1010_v3 = vrot.slane %v997_v0, 4  ;;  %v1018_v5 = vld [vmem:[%s1501_s0 + $0x8] sm:$0xff]  ;;  %v1025_v6 = vrot.slane %v1007_v2, 4  ;;  %s968_s24 = smov 113   ;;  %s969_s25 = smov 127  }
   0x3   :  { %v1013_v4 = vrot.slane %v1002_v1, 4  ;;  %v1028_v7 = vrot.slane %v1018_v5, 4  ;;  %s970_s26 = smov 112   ;;  %s971_s27 = smov 111   ;;  %v1075_v9 = vld [vmem:[%s1501_s0 + $0x30] sm:$0xff]  ;;  %v1080_v10 = vld [vmem:[%s1501_s0 + $0x18] sm:$0xff] }
   0x4   :  { %80 = vrot.lane.b32.xlu1 %v1010_v3, %s964_s20  ;;  %v1089_v11 = vld [vmem:[%s1501_s0 + $0x38] sm:$0xff]  ;;  %v380_v12 = vrot.slane %v1080_v10, 4  ;;  %v379_v13 = vrot.slane %v1067_v8, 4  ;;  %v381_v16 = vrot.slane %v1075_v9, 4  ;;  %v1112_v22 = vshrl.u32 %v56_v19, 7  ;;  %v1118_v26 = vld [vmem:[%s1502_s1] sm:$0xff] }
   0x5   :  { %76 = vrot.lane.b32.xlu0 %v1013_v4, %s964_s20  ;;  %v382_v15 = vrot.slane %v1089_v11, 4  ;;  %v1124_v28 = vld [vmem:[%s1502_s1 + $0x18] sm:$0xff]  ;;  %v1129_v29 = vld [vmem:[%s1502_s1 + $0x8] sm:$0xff]  ;;  %v1134_v30 = vld [vmem:[%s1502_s1 + $0x10] sm:$0xff]  ;;  %vm121_vm3 = vcmask 121856   ;;  %vm511_vm4 = vcmask 1043456  }
   0x6   :  { %v95_v25 = vsub.s32 1, %v1112_v22  ;;  %v169_v27 = vsub.s32 3, %v1112_v22  ;;  %v58_v34 = vsub.s32 0, %v1112_v22  ;;  %v132_v48 = vsub.s32 2, %v1112_v22 }
   0x7   :  { %vm232_vm5 = vcmask 924672   ;;  %vm195_vm6 = vcmask 1039360   ;;  %vm269_vm7 = vcmask 916480   ;;  %vm306_vm8 = vcmask 908288  }
   0x8   :  { %82 = vrot.lane.b32.xlu1 %v1025_v6, %s964_s20  ;;  %v1137_v33 = vrot.slane %v1118_v26, %v95_v25  ;;  %v1141_v35 = vrot.slane %v1124_v28, %v95_v25  ;;  %v1144_v36 = vrot.slane %v1129_v29, %v95_v25  ;;  %v1147_v37 = vrot.slane %v1134_v30, %v95_v25 }
   0x9   :  { %78 = vrot.lane.b32.xlu0 %v1028_v7, %s964_s20  ;;  %v1150_v38 = vrot.slane %v1118_v26, %v169_v27  ;;  %v1155_v41 = vrot.slane %v1129_v29, %v169_v27  ;;  %v1158_v42 = vrot.slane %v1134_v30, %v169_v27  ;;  %v1163_v47 = vrot.slane %v1124_v28, %v169_v27 }
   0xa   :  { %v59_v49 = vrot.slane %v1118_v26, %v58_v34  ;;  %v63_v50 = vrot.slane %v1129_v29, %v58_v34  ;;  %v67_v51 = vrot.slane %v1134_v30, %v58_v34  ;;  %v71_v52 = vrot.slane %v1124_v28, %v58_v34 }
   0xb   :  { %v133_v63 = vrot.slane %v1118_v26, %v132_v48  ;;  %vm553_vm9 = vcmask 1044480   ;;  %vm973_vm10 = vmmov 1   ;;  %vm546_vm12 = vcmask 498688  }
   0xc   :  { %152 = vrot.lane.b32.xlu1 %v1028_v7, %s965_s21  ;;  %vm1330_vm11 = vmpackc.low %vm553_vm9, %vm973_vm10  ;;  %vm772_vm13 = vcmask 1040384   ;;  %vm775_vm14 = vcmask 1041408   ;;  %vm778_vm15 = vcmask 1042432  }
   0xd   :  { %150 = vrot.lane.b32.xlu0 %v1013_v4, %s965_s21 }
  0x10   :  { %156 = vrot.lane.b32.xlu1 %v1025_v6, %s965_s21 }
  0x11   :  { %154 = vrot.lane.b32.xlu0 %v1010_v3, %s965_s21 }
  0x14   :  { %41 = vrot.lane.b32.xlu1 %v1028_v7, %s966_s22 }
  0x15   :  { %39 = vrot.lane.b32.xlu0 %v1013_v4, %s966_s22 }
  0x18   :  { %45 = vrot.lane.b32.xlu1 %v1025_v6, %s966_s22 }
  0x19   :  { %43 = vrot.lane.b32.xlu0 %v1010_v3, %s966_s22 }
  0x1c   :  { %115 = vrot.lane.b32.xlu1 %v1028_v7, %s967_s23 }
  0x1d   :  { %113 = vrot.lane.b32.xlu0 %v1013_v4, %s967_s23 }
  0x20   :  { %119 = vrot.lane.b32.xlu1 %v1025_v6, %s967_s23 }
  0x21   :  { %117 = vrot.lane.b32.xlu0 %v1010_v3, %s967_s23 }
  0x24   :  { %228 = vrot.lane.b32.xlu1 %v997_v0, %s968_s24 }
  0x25   :  { %226 = vrot.lane.b32.xlu0 %v1018_v5, %s968_s24 }
  0x28   :  { %224 = vrot.lane.b32.xlu1 %v1002_v1, %s968_s24 }
  0x29   :  { %230 = vrot.lane.b32.xlu0 %v1007_v2, %s968_s24 }
  0x2c   :  { %191 = vrot.lane.b32.xlu1 %v997_v0, %s969_s25 }
  0x2d   :  { %189 = vrot.lane.b32.xlu0 %v1018_v5, %s969_s25 }
  0x30   :  { %263 = vrot.lane.b32.xlu1 %v1018_v5, %s970_s26 }
  0x31   :  { %193 = vrot.lane.b32.xlu0 %v1007_v2, %s969_s25 }
  0x34   :  { %267 = vrot.lane.b32.xlu1 %v1007_v2, %s970_s26 }
  0x35   :  { %265 = vrot.lane.b32.xlu0 %v997_v0, %s970_s26 }
  0x38   :  { %261 = vrot.lane.b32.xlu1 %v1002_v1, %s970_s26 }
  0x39   :  { %187 = vrot.lane.b32.xlu0 %v1002_v1, %s969_s25 }
  0x3c   :  { %302 = vrot.lane.b32.xlu1 %v997_v0, %s971_s27 }
  0x3d   :  { %300 = vrot.lane.b32.xlu0 %v1018_v5, %s971_s27 }
  0x40   :  { %339 = vrot.lane.b32.xlu1 %v1067_v8, %s964_s20 }
  0x41   :  { %304 = vrot.lane.b32.xlu0 %v1007_v2, %s971_s27 }
  0x44   :  { %343 = vrot.lane.b32.xlu1 %v1075_v9, %s964_s20 }
  0x45   :  { %341 = vrot.lane.b32.xlu0 %v1080_v10, %s964_s20 }
  0x48   :  { %361 = vrot.lane.b32.xlu1 %v1080_v10, %s970_s26 }
  0x49   :  { %345 = vrot.lane.b32.xlu0 %v1089_v11, %s964_s20 }
  0x4c   :  { %365 = vrot.lane.b32.xlu1 %v1089_v11, %s970_s26 }
  0x4d   :  { %363 = vrot.lane.b32.xlu0 %v1075_v9, %s970_s26 }
  0x50   :  { %359 = vrot.lane.b32.xlu1 %v1067_v8, %s970_s26 }
  0x51   :  { %298 = vrot.lane.b32.xlu0 %v1002_v1, %s971_s27 }
  0x54   :  { %407 = vrot.lane.b32.xlu1 %v1075_v9, %s969_s25 }
  0x55   :  { %405 = vrot.lane.b32.xlu0 %v1080_v10, %s969_s25 }
  0x58   :  { %403 = vrot.lane.b32.xlu1 %v1067_v8, %s969_s25 }
  0x59   :  { %409 = vrot.lane.b32.xlu0 %v1089_v11, %s969_s25 }
  0x5c   :  { %385 = vrot.lane.b32.xlu1 %v380_v12, %s965_s21  ;;  %v137_v12 = vrot.slane %v1129_v29, %v132_v48 }
  0x5d   :  { %383 = vrot.lane.b32.xlu0 %v379_v13, %s965_s21 }
  0x60   :  { %389 = vrot.lane.b32.xlu1 %v382_v15, %s965_s21 }
  0x61   :  { %387 = vrot.lane.b32.xlu0 %v381_v16, %s965_s21  ;;  %v141_v16 = vrot.slane %v1134_v30, %v132_v48 }
  0x76   :  { %v81_v17 = vpop.permute.xlu1 %80 }
  0x77   :  { %v77_v18 = vpop.permute.xlu0 %76 }
  0x78   :  { %v92_v39 = vsel %vm84_vm0, 0.0, %v77_v18 }
  0x79   :  { %v109_v53 = vmul.f32 %v1137_v33, %v92_v39 }
  0x7a   :  { %v83_v20 = vpop.permute.xlu1 %82 }
  0x7b   :  { %v79_v21 = vpop.permute.xlu0 %78  ;;  %v87_v54 = vsel %vm84_vm0, %v81_v17, %v83_v20 }
  0x7c   :  { %v85_v40 = vsel %vm84_vm0, %v77_v18, %v79_v21  ;;  %v86_v55 = vsel %vm84_vm0, %v79_v21, %v81_v17  ;;  %v112_v13 = vmul.f32 %v1141_v35, %v87_v54  ;;  %v145_v17 = vrot.slane %v1124_v28, %v132_v48 }
  0x7d   :  { %v110_v56 = vmul.f32 %v1144_v36, %v85_v40  ;;  %v111_v15 = vmul.f32 %v1147_v37, %v86_v55 }
  0x7e   :  { %v153_v23 = vpop.permute.xlu1 %152 }
  0x7f   :  { %v151_v24 = vpop.permute.xlu0 %150  ;;  %v428_v25 = vrot.slane %v110_v56, 4 }
  0x80   :  { %v159_v45 = vsel %vm158_vm1, %v151_v24, %v153_v23  ;;  %v166_v46 = vsel %vm158_vm1, 0.0, %v151_v24  ;;  %v427_v24 = vrot.slane %v109_v53, 4  ;;  %v429_v53 = vrot.slane %v111_v15, 4 }
  0x81   :  { %v183_v57 = vmul.f32 %v1150_v38, %v166_v46  ;;  %v184_v58 = vmul.f32 %v1155_v41, %v159_v45 }
  0x82   :  { %v157_v31 = vpop.permute.xlu1 %156 }
  0x83   :  { %v155_v32 = vpop.permute.xlu0 %154  ;;  %v439_v27 = vrot.slane %v183_v57, 4  ;;  %v440_v34 = vrot.slane %v184_v58, 4 }
  0x84   :  { %v160_v18 = vsel %vm158_vm1, %v153_v23, %v155_v32  ;;  %v161_v19 = vsel %vm158_vm1, %v155_v32, %v157_v31 }
  0x85   :  { %v185_v23 = vmul.f32 %v1158_v42, %v160_v18  ;;  %v186_v31 = vmul.f32 %v1163_v47, %v161_v19 }
  0x86   :  { %v42_v43 = vpop.permute.xlu1 %41 }
  0x87   :  { %v40_v44 = vpop.permute.xlu0 %39  ;;  %v442_v15 = vrot.slane %v186_v31, 4 }
  0x88   :  { %v48_v59 = vsel %vm47_vm2, %v40_v44, %v42_v43  ;;  %v55_v60 = vsel %vm47_vm2, 0.0, %v40_v44 }
  0x89   :  { %v72_v20 = vmul.f32 %v59_v49, %v55_v60  ;;  %v73_v21 = vmul.f32 %v63_v50, %v48_v59  ;;  %v430_v50 = vrot.slane %v112_v13, 4  ;;  %v441_v13 = vrot.slane %v185_v23, 4 }
  0x8a   :  { %v46_v61 = vpop.permute.xlu1 %45 }
  0x8b   :  { %v44_v62 = vpop.permute.xlu0 %43  ;;  %v513_v54 = vsel %vm511_vm4, %v73_v21, %v428_v25  ;;  %v512_v55 = vsel %vm511_vm4, %v72_v20, %v427_v24 }
  0x8c   :  { %v49_v44 = vsel %vm47_vm2, %v42_v43, %v44_v62  ;;  %v50_v45 = vsel %vm47_vm2, %v44_v62, %v46_v61 }
  0x8d   :  { %v74_v56 = vmul.f32 %v67_v51, %v49_v44  ;;  %v75_v43 = vmul.f32 %v71_v52, %v50_v45 }
  0x8e   :  { %v116_v39 = vpop.permute.xlu1 %115 }
  0x8f   :  { %v114_v40 = vpop.permute.xlu0 %113  ;;  %v515_v52 = vsel %vm511_vm4, %v75_v43, %v430_v50  ;;  %v514_v24 = vsel %vm511_vm4, %v74_v56, %v429_v53 }
  0x90   :  { %v122_v46 = vsel %vm121_vm3, %v114_v40, %v116_v39  ;;  %v129_v48 = vsel %vm121_vm3, 0.0, %v114_v40 }
  0x91   :  { %v146_v32 = vmul.f32 %v133_v63, %v129_v48  ;;  %v147_v49 = vmul.f32 %v137_v12, %v122_v46 }
  0x92   :  { %v120_v57 = vpop.permute.xlu1 %119 }
  0x93   :  { %v118_v58 = vpop.permute.xlu0 %117  ;;  %v517_v59 = vsel %vm511_vm4, %v147_v49, %v440_v34  ;;  %v516_v60 = vsel %vm511_vm4, %v146_v32, %v439_v27  ;;  %v280_v49 = vsub.s32 7, %v1112_v22 }
  0x94   :  { %v123_v61 = vsel %vm121_vm3, %v116_v39, %v118_v58  ;;  %v124_v62 = vsel %vm121_vm3, %v118_v58, %v120_v57  ;;  %v918_v63 = vpack.c.bf16 %v517_v59, %v513_v54  ;;  %v920_v12 = vpack.c.bf16 %v516_v60, %v512_v55 }
  0x95   :  { %v148_v18 = vmul.f32 %v141_v16, %v123_v61  ;;  %v149_v19 = vmul.f32 %v145_v17, %v124_v62  ;;  %v243_v39 = vsub.s32 6, %v1112_v22  ;;  %v206_v17 = vsub.s32 5, %v1112_v22 }
  0x96   :  { %919 = vmatprep.subr.bf16.mxu0 %v918_v63  ;;  %v229_v20 = vpop.permute.xlu1 %228 }
  0x97   :  { %921 = vmatpush1.bf16.msra.mxu0 %v920_v12  ;;  %v227_v51 = vpop.permute.xlu0 %226  ;;  %v519_v21 = vsel %vm511_vm4, %v149_v19, %v442_v15  ;;  %v518_v25 = vsel %vm511_vm4, %v148_v18, %v441_v13  ;;  %v248_v44 = vrot.slane %v1129_v29, %v243_v39  ;;  %v252_v23 = vrot.slane %v1134_v30, %v243_v39 }
  0x98   :  { %v936_v27 = vpack.c.bf16 %v519_v21, %v515_v52  ;;  %v938_v34 = vpack.c.bf16 %v518_v25, %v514_v24  ;;  %v234_v48 = vsel %vm232_vm5, %v227_v51, %v229_v20  ;;  %v256_v31 = vrot.slane %v1124_v28, %v243_v39 }
  0x99   :  { %v244_v50 = vrot.slane %v1118_v26, %v243_v39  ;;  %v1213_v54 = vrot.slane %v1129_v29, %v206_v17  ;;  %v1216_v55 = vrot.slane %v1124_v28, %v206_v17  ;;  %v258_v56 = vmul.f32 %v248_v44, %v234_v48 }
  0x9a   :  { %937 = vmatprep.subr.bf16.mxu1 %v936_v27  ;;  %v225_v40 = vpop.permute.xlu1 %224  ;;  %v1220_v58 = vrot.slane %v1134_v30, %v206_v17  ;;  %v1226_v12 = vrot.slane %v1124_v28, %v280_v49  ;;  %v1229_v13 = vrot.slane %v1129_v29, %v280_v49  ;;  %v1232_v15 = vrot.slane %v1134_v30, %v280_v49 }
  0x9b   :  { %939 = vmatpush1.bf16.msra.mxu1 %v938_v34  ;;  %v231_v16 = vpop.permute.xlu0 %230  ;;  %v233_v22 = vsel %vm232_vm5, %v225_v40, %v227_v51  ;;  %v456_v51 = vrot.slane %v258_v56, 4  ;;  %v1241_v25 = vrot.slane %v1118_v26, %v206_v17 }
  0x9c   :  { %v235_v32 = vsel %vm232_vm5, %v229_v20, %v231_v16  ;;  %v240_v53 = vsel %vm232_vm5, %v231_v16, 0.0  ;;  %v1237_v20 = vrot.slane %v1118_v26, %v280_v49  ;;  %v257_v52 = vmul.f32 %v244_v50, %v233_v22 }
  0x9d   :  { %v259_v60 = vmul.f32 %v252_v23, %v235_v32  ;;  %v260_v63 = vmul.f32 %v256_v31, %v240_v53 }
  0x9e   :  { %v192_v45 = vpop.permute.xlu1 %191 }
  0x9f   :  { %v190_v46 = vpop.permute.xlu0 %189  ;;  %v457_v29 = vrot.slane %v259_v60, 4  ;;  %v458_v39 = vrot.slane %v260_v63, 4 }
  0xa0   :  { %v197_v43 = vsel %vm195_vm6, %v190_v46, %v192_v45 }
  0xa1   :  { %v221_v18 = vmul.f32 %v1213_v54, %v197_v43  ;;  %v455_v43 = vrot.slane %v257_v52, 4  ;;  %v903_v52 = vld [vmem:[%s1502_s1 + $0x28] ss:$0 sm:$0xff] }
  0xa2   :  { %v264_v57 = vpop.permute.xlu1 %263 }
  0xa3   :  { %v194_v59 = vpop.permute.xlu0 %193 }
  0xa4   :  { %v198_v61 = vsel %vm195_vm6, %v192_v45, %v194_v59  ;;  %v203_v62 = vsel %vm195_vm6, %v194_v59, 0.0  ;;  %v521_v45 = vsel %vm511_vm4, %v1028_v7, %v221_v18 }
  0xa5   :  { %v223_v19 = vmul.f32 %v1216_v55, %v203_v62  ;;  %v222_v21 = vmul.f32 %v1220_v58, %v198_v61 }
  0xa6   :  { %v268_v24 = vpop.permute.xlu1 %267 }
  0xa7   :  { %v266_v28 = vpop.permute.xlu0 %265  ;;  %v277_v30 = vsel %vm269_vm7, %v268_v24, 0.0  ;;  %v523_v26 = vsel %vm511_vm4, %v1025_v6, %v223_v19  ;;  %v522_v32 = vsel %vm511_vm4, %v1010_v3, %v222_v21 }
  0xa8   :  { %v271_v27 = vsel %vm269_vm7, %v264_v57, %v266_v28  ;;  %v272_v34 = vsel %vm269_vm7, %v266_v28, %v268_v24  ;;  %v297_v40 = vmul.f32 %v1226_v12, %v277_v30 }
  0xa9   :  { %v295_v16 = vmul.f32 %v1229_v13, %v271_v27  ;;  %v296_v44 = vmul.f32 %v1232_v15, %v272_v34  ;;  %v904_v34 = vld [vmem:[%s1502_s1 + $0x30] ss:$0 sm:$0xff] }
  0xaa   :  { %v262_v17 = vpop.permute.xlu1 %261  ;;  %v527_v31 = vsel %vm511_vm4, %v458_v39, %v297_v40 }
  0xab   :  { %v188_v48 = vpop.permute.xlu0 %187  ;;  %v525_v23 = vsel %vm511_vm4, %v456_v51, %v295_v16  ;;  %v526_v49 = vsel %vm511_vm4, %v457_v29, %v296_v44  ;;  %v270_v50 = vsel %vm269_vm7, %v262_v17, %v264_v57  ;;  %v940_v7 = vpack.c.bf16 %v527_v31, %v523_v26 }
  0xac   :  { %v196_v53 = vsel %vm195_vm6, %v188_v48, %v190_v46  ;;  %v922_v56 = vpack.c.bf16 %v525_v23, %v521_v45  ;;  %v294_v6 = vmul.f32 %v1237_v20, %v270_v50  ;;  %v942_v22 = vpack.c.bf16 %v526_v49, %v522_v32 }
  0xad   :  { %v220_v59 = vmul.f32 %v1241_v25, %v196_v53  ;;  %941 = vmatprep.subr.bf16.mxu1 %v940_v7 }
  0xae   :  { %923 = vmatprep.subr.bf16.mxu0 %v922_v56  ;;  %v303_v60 = vpop.permute.xlu1 %302  ;;  %943 = vmatpush1.bf16.msra.mxu1 %v942_v22  ;;  %v524_v57 = vsel %vm511_vm4, %v455_v43, %v294_v6  ;;  %v902_v22 = vld [vmem:[%s1502_s1 + $0x20] ss:$0 sm:$0xff] }
  0xaf   :  { %v301_v61 = vpop.permute.xlu0 %300  ;;  %v520_v3 = vsel %vm511_vm4, %v1013_v4, %v220_v59  ;;  %v905_v4 = vld [vmem:[%s1502_s1 + $0x38] ss:$0 sm:$0xff] }
  0xb0   :  { %v924_v62 = vpack.c.bf16 %v524_v57, %v520_v3  ;;  %v308_v21 = vsel %vm306_vm8, %v301_v61, %v303_v60 }
  0xb1   :  { %v332_v44 = vmul.f32 %v903_v52, %v308_v21 }
  0xb2   :  { %925 = vmatpush1.bf16.msra.mxu0 %v924_v62  ;;  %v340_v46 = vpop.permute.xlu1 %339 }
  0xb3   :  { %v305_v63 = vpop.permute.xlu0 %304  ;;  %v354_v17 = vsel %vm84_vm0, 0.0, %v340_v46 }
  0xb4   :  { %v314_v24 = vsel %vm306_vm8, %v305_v63, 0.0  ;;  %v309_v39 = vsel %vm306_vm8, %v303_v60, %v305_v63  ;;  %v355_v43 = vmul.f32 %v354_v17, %v1137_v33 }
  0xb5   :  { %v334_v45 = vmul.f32 %v905_v4, %v314_v24  ;;  %v333_v48 = vmul.f32 %v904_v34, %v309_v39 }
  0xb6   :  { %v344_v18 = vpop.permute.xlu1 %343 }
  0xb7   :  { %v342_v19 = vpop.permute.xlu0 %341  ;;  %v470_v6 = vrot.slane %v334_v45, 4  ;;  %v469_v60 = vrot.slane %v333_v48, 4 }
  0xb8   :  { %v347_v51 = vsel %vm84_vm0, %v340_v46, %v342_v19  ;;  %v348_v28 = vsel %vm84_vm0, %v342_v19, %v344_v18 }
  0xb9   :  { %v356_v29 = vmul.f32 %v347_v51, %v1144_v36  ;;  %v357_v26 = vmul.f32 %v348_v28, %v1147_v37  ;;  %v468_v37 = vrot.slane %v332_v44, 4  ;;  %v479_v28 = vrot.slane %v355_v43, 4 }
  0xba   :  { %v362_v30 = vpop.permute.xlu1 %361 }
  0xbb   :  { %v346_v27 = vpop.permute.xlu0 %345  ;;  %v480_v36 = vrot.slane %v356_v29, 4  ;;  %v481_v59 = vrot.slane %v357_v26, 4 }
  0xbc   :  { %v349_v40 = vsel %vm84_vm0, %v344_v18, %v346_v27  ;;  %vm785_vm0 = vcmask 1045504  }
  0xbd   :  { %v358_v16 = vmul.f32 %v349_v40, %v1141_v35  ;;  %v530_v24 = vsel %vm511_vm4, %v469_v60, %v481_v59 }
  0xbe   :  { %v366_v23 = vpop.permute.xlu1 %365 }
  0xbf   :  { %v364_v31 = vpop.permute.xlu0 %363  ;;  %v482_v32 = vrot.slane %v358_v16, 4  ;;  %v374_v49 = vsel %vm269_vm7, %v366_v23, 0.0 }
  0xc0   :  { %v368_v50 = vsel %vm269_vm7, %v362_v30, %v364_v31  ;;  %v369_v53 = vsel %vm269_vm7, %v364_v31, %v366_v23  ;;  %v378_v56 = vmul.f32 %v374_v49, %v1226_v12 }
  0xc1   :  { %v376_v35 = vmul.f32 %v368_v50, %v1229_v13  ;;  %v377_v7 = vmul.f32 %v369_v53, %v1232_v15  ;;  %v529_v15 = vsel %vm511_vm4, %v468_v37, %v480_v36  ;;  %v531_v33 = vsel %vm511_vm4, %v470_v6, %v482_v32 }
  0xc2   :  { %v494_v3 = vrot.slane %v378_v56, 4  ;;  %v360_v46 = vpop.permute.xlu1 %359 }
  0xc3   :  { %v492_v57 = vrot.slane %v376_v35, 4  ;;  %v493_v62 = vrot.slane %v377_v7, 4  ;;  %v299_v63 = vpop.permute.xlu0 %298  ;;  %v367_v12 = vsel %vm269_vm7, %v360_v46, %v362_v30 }
  0xc4   :  { %v307_v13 = vsel %vm306_vm8, %v299_v63, %v301_v61  ;;  %v375_v18 = vmul.f32 %v367_v12, %v1237_v20  ;;  %v535_v52 = vsel %vm511_vm4, %v1089_v11, %v494_v3 }
  0xc5   :  { %v331_v19 = vmul.f32 %v902_v22, %v307_v13  ;;  %v533_v51 = vsel %vm511_vm4, %v1080_v10, %v492_v57  ;;  %v944_v4 = vpack.c.bf16 %v535_v52, %v531_v33  ;;  %v534_v61 = vsel %vm511_vm4, %v1075_v9, %v493_v62 }
  0xc6   :  { %v926_v21 = vpack.c.bf16 %v533_v51, %v529_v15  ;;  %v491_v29 = vrot.slane %v375_v18, 4  ;;  %v408_v27 = vpop.permute.xlu1 %407  ;;  %v946_v20 = vpack.c.bf16 %v534_v61, %v530_v24  ;;  %v736_v18 = vrot.slane %v1002_v1, 5 }
  0xc7   :  { %v467_v30 = vrot.slane %v331_v19, 4  ;;  %v406_v34 = vpop.permute.xlu0 %405  ;;  %945 = vmatprep.subr.bf16.mxu1 %v944_v4  ;;  %v760_v19 = vrot.slane %v1002_v1, 7  ;;  %v837_v51 = vrot.slane %v997_v0, 2  ;;  %v737_v52 = vrot.slane %v1018_v5, 5 }
  0xc8   :  { %v412_v39 = vsel %vm195_vm6, %v406_v34, %v408_v27  ;;  %927 = vmatprep.subr.bf16.mxu0 %v926_v21  ;;  %947 = vmatpush1.bf16.msra.mxu1 %v946_v20  ;;  %v532_v16 = vsel %vm511_vm4, %v1067_v8, %v491_v29  ;;  %v749_v21 = vrot.slane %v1018_v5, 2  ;;  %v761_v4 = vrot.slane %v1018_v5, 7 }
  0xc9   :  { %v528_v40 = vsel %vm511_vm4, %v467_v30, %v479_v28  ;;  %v420_v44 = vmul.f32 %v412_v39, %v1213_v54  ;;  %v825_v24 = vrot.slane %v997_v0, 5  ;;  %v849_v61 = vrot.slane %v997_v0, 7 }
  0xca   :  { %v928_v45 = vpack.c.bf16 %v532_v16, %v528_v40  ;;  %v404_v26 = vpop.permute.xlu1 %403  ;;  %v838_v28 = vrot.slane %v1007_v2, 2  ;;  %v826_v16 = vrot.slane %v1007_v2, 5 }
  0xcb   :  { %v410_v17 = vpop.permute.xlu0 %409  ;;  %v411_v48 = vsel %vm195_vm6, %v404_v26, %v406_v34  ;;  %v504_v32 = vrot.slane %v420_v44, 4  ;;  %v850_v44 = vrot.slane %v1007_v2, 7 }
  0xcc   :  { %v413_v36 = vsel %vm195_vm6, %v408_v27, %v410_v17  ;;  %v418_v23 = vsel %vm195_vm6, %v410_v17, 0.0  ;;  %929 = vmatpush1.bf16.msra.mxu0 %v928_v45  ;;  %v419_v31 = vmul.f32 %v411_v48, %v1241_v25 }
  0xcd   :  { %v421_v50 = vmul.f32 %v413_v36, %v1220_v58  ;;  %v422_v53 = vmul.f32 %v418_v23, %v1216_v55  ;;  %v541_v43 = vsel %vm511_vm4, %v504_v32, 1.0 }
  0xce   :  { %v503_v49 = vrot.slane %v419_v31, 4  ;;  %v386_v56 = vpop.permute.xlu1 %385 }
  0xcf   :  { %v384_v54 = vpop.permute.xlu0 %383  ;;  %v505_v59 = vrot.slane %v421_v50, 4  ;;  %v506_v22 = vrot.slane %v422_v53, 4 }
  0xd0   :  { %v391_v35 = vsel %vm158_vm1, %v384_v54, %v386_v56  ;;  %v398_v7 = vsel %vm158_vm1, 0.0, %v384_v54  ;;  %v540_v25 = vsel %vm511_vm4, %v503_v49, 1.0 }
  0xd1   :  { %v399_v37 = vmul.f32 %v398_v7, %v1150_v38  ;;  %v400_v6 = vmul.f32 %v391_v35, %v1155_v41  ;;  %v542_v12 = vsel %vm511_vm4, %v505_v59, 1.0 }
  0xd2   :  { %v390_v58 = vpop.permute.xlu1 %389 }
  0xd3   :  { %v536_v55 = vsel %vm511_vm4, %v399_v37, %v1067_v8  ;;  %v388_v60 = vpop.permute.xlu0 %387  ;;  %v537_v3 = vsel %vm511_vm4, %v400_v6, %v1080_v10  ;;  %v543_v10 = vsel %vm511_vm4, %v506_v22, 1.0 }
  0xd4   :  { %v392_v57 = vsel %vm158_vm1, %v386_v56, %v388_v60  ;;  %v393_v38 = vsel %vm158_vm1, %v388_v60, %v390_v58  ;;  %v933_v62 = vpack.c.bf16 %v540_v25, %v536_v55  ;;  %v930_v63 = vpack.c.bf16 %v541_v43, %v537_v3 }
  0xd5   :  { %v401_v46 = vmul.f32 %v392_v57, %v1158_v42  ;;  %v402_v8 = vmul.f32 %v393_v38, %v1163_v47  ;;  %v544_v42 = vld [vmem:[%s1503_s2] sm:$0xff]  ;;  %vm788_vm1 = vcmask 1046528  }
  0xd6   :  { %932 = vmatprep.subr.msk.bf16.mxu0 %vm1330_vm11, %v930_v63 }
  0xd7   :  { %v538_v13 = vsel %vm511_vm4, %v401_v46, %v1075_v9  ;;  %v539_v15 = vsel %vm511_vm4, %v402_v8, %v1089_v11  ;;  %935 = vmatpush1.bf16.msk.msra.mxu0 %vm1330_vm11, %v933_v62  ;;  %v545_v9 = vld [vmem:[%s1503_s2 + $0x8] sm:$0xf]  ;;  %v748_v11 = vrot.slane %v1002_v1, 2 }
  0xd8   :  { %v948_v47 = vpack.c.bf16 %v543_v10, %v539_v15  ;;  %v951_v33 = vpack.c.bf16 %v542_v12, %v538_v13 }
  0xda   :  { %950 = vmatprep.subr.msk.bf16.mxu1 %vm1330_vm11, %v948_v47  ;;  %908 = vmatmul.mubr.msk.f32.vlgmr.msra.gmra.mrb[0].mxu0 %vm546_vm12, %v544_v42 }
  0xdb   :  { %953 = vmatpush1.bf16.msk.msra.mxu1 %vm1330_vm11, %v951_v33  ;;  %636 = vmatprep.mubr.f32.mxu0 %v972_v14 }
  0xde   :  { %912 = vmatmul.mubr.msk.f32.vlgmr.msra.gmra.mrb[0].mxu1 %vm546_vm12, %v544_v42  ;;  %909 = vmatmul.mubr.msk.f32.gmra.mrb[2].mxu0 %vm546_vm12, %v545_v9 }
  0xdf   :  { %713 = vmatprep.mubr.f32.mxu1 %v972_v14 }
  0xe2   :  { %913 = vmatmul.mubr.msk.f32.gmra.mrb[2].mxu1 %vm546_vm12, %v545_v9 }
 0x1ad   :  { %v632_v14 = vpop.f32.mrb[0].mxu0 }
 0x1ae   :  { %v722_v29 = vrot.slane %v632_v14, 7  ;;  %v726_v30 = vrot.slane %v632_v14, 2  ;;  %v740_v27 = vrot.slane %v632_v14, 4  ;;  %v752_v34 = vrot.slane %v632_v14, 1  ;;  %v1368_v20 = vpop.f32.mrb[1].mxu0 }
 0x1af   :  { %v764_v39 = vrot.slane %v632_v14, 6  ;;  %v723_v40 = vrot.slane %v1368_v20, 7  ;;  %v727_v17 = vrot.slane %v1368_v20, 2  ;;  %v741_v48 = vrot.slane %v1368_v20, 4 }
 0x1b0   :  { %v773_v45 = vsel %vm772_vm13, %v1002_v1, %v722_v29  ;;  %v791_v26 = vsel %vm772_vm13, %v748_v11, %v752_v34  ;;  %v753_v23 = vrot.slane %v1368_v20, 1  ;;  %v765_v1 = vrot.slane %v1368_v20, 6 }
 0x1b1   :  { %v1378_v36 = vpop.f32.mrb[0].mxu1  ;;  %v638_v31 = vpop.f32.mrb[2].mxu0  ;;  %v776_v32 = vsel %vm775_vm14, %v773_v45, %v726_v30  ;;  %v793_v49 = vsel %vm775_vm14, %v791_v26, %v740_v27  ;;  %v774_v12 = vsel %vm772_vm13, %v1018_v5, %v723_v40 }
 0x1b2   :  { %v811_v50 = vrot.slane %v1378_v36, 7  ;;  %v1384_v53 = vpop.f32.mrb[1].mxu1  ;;  %v732_v56 = vrot.slane %v638_v31, 5  ;;  %v756_v54 = vrot.slane %v638_v31, 7  ;;  %v815_v35 = vrot.slane %v1378_v36, 2  ;;  %v640_v7 = vpop.f32.mrb[3].mxu0 }
 0x1b3   :  { %v744_v37 = vrot.slane %v638_v31, 2  ;;  %v768_v43 = vrot.slane %v638_v31, 4  ;;  %v829_v6 = vrot.slane %v1378_v36, 4  ;;  %v841_v25 = vrot.slane %v1378_v36, 1 }
 0x1b4   :  { %v779_v59 = vsel %vm778_vm15, %v776_v32, %v732_v56  ;;  %v795_v22 = vsel %vm778_vm15, %v793_v49, %v756_v54  ;;  %v853_v55 = vrot.slane %v1378_v36, 6  ;;  %v733_v58 = vrot.slane %v640_v7, 5 }
 0x1b5   :  { %v715_v60 = vpop.f32.mrb[2].mxu1  ;;  %v781_v3 = vsel %vm511_vm4, %v779_v59, %v736_v18  ;;  %v797_v57 = vsel %vm511_vm4, %v795_v22, %v760_v19  ;;  %v861_v38 = vsel %vm772_vm13, %v997_v0, %v811_v50  ;;  %v757_v41 = vrot.slane %v640_v7, 7 }
 0x1b6   :  { %v1399_v62 = vpop.f32.mrb[3].mxu1  ;;  %v783_v46 = vsel %vm553_vm9, %v781_v3, %v740_v27  ;;  %v799_v8 = vsel %vm553_vm9, %v797_v57, %v764_v39  ;;  %v745_v63 = vrot.slane %v640_v7, 2  ;;  %v777_v15 = vsel %vm775_vm14, %v774_v12, %v727_v17 }
 0x1b7   :  { %v786_v10 = vsel %vm785_vm0, %v783_v46, %v722_v29  ;;  %v801_v13 = vsel %vm785_vm0, %v799_v8, %v752_v34  ;;  %v792_v42 = vsel %vm772_vm13, %v749_v21, %v753_v23  ;;  %v780_v9 = vsel %vm778_vm15, %v777_v15, %v733_v58 }
 0x1b8   :  { %v789_v47 = vsel %vm788_vm1, %v786_v10, %v744_v37  ;;  %v803_v33 = vsel %vm788_vm1, %v801_v13, %v768_v43  ;;  %v794_v11 = vsel %vm775_vm14, %v792_v42, %v741_v48  ;;  %v875_v18 = vsel %vm772_vm13, %v837_v51, %v841_v25 }
 0x1b9   :  { %805 = vst [vmem:[%s1504_s3] sm:$0xff] %v789_v47  ;;  %807 = vst [vmem:[%s1504_s3 + $0x10] sm:$0xff] %v803_v33  ;;  %v769_v19 = vrot.slane %v640_v7, 4  ;;  %v782_v21 = vsel %vm511_vm4, %v780_v9, %v737_v52  ;;  %v796_v14 = vsel %vm778_vm15, %v794_v11, %v757_v41  ;;  %v812_v27 = vrot.slane %v1384_v53, 7 }
 0x1ba   :  { %v784_v29 = vsel %vm553_vm9, %v782_v21, %v741_v48  ;;  %v798_v30 = vsel %vm511_vm4, %v796_v14, %v761_v4  ;;  %v816_v34 = vrot.slane %v1384_v53, 2  ;;  %v830_v39 = vrot.slane %v1384_v53, 4 }
 0x1bb   :  { %v787_v20 = vsel %vm785_vm0, %v784_v29, %v723_v40  ;;  %v800_v51 = vsel %vm553_vm9, %v798_v30, %v765_v1  ;;  %v821_v45 = vrot.slane %v715_v60, 5  ;;  %v842_v17 = vrot.slane %v1384_v53, 1 }
 0x1bc   :  { %v790_v52 = vsel %vm788_vm1, %v787_v20, %v745_v63  ;;  %v802_v26 = vsel %vm785_vm0, %v800_v51, %v753_v23  ;;  %v845_v5 = vrot.slane %v715_v60, 7  ;;  %v854_v40 = vrot.slane %v1384_v53, 6 }
 0x1bd   :  { %v804_v4 = vsel %vm788_vm1, %v802_v26, %v769_v19  ;;  %806 = vst [vmem:[%s1504_s3 + $0x8] sm:$0xff] %v790_v52  ;;  %v863_v48 = vsel %vm775_vm14, %v861_v38, %v815_v35  ;;  %v877_v31 = vsel %vm775_vm14, %v875_v18, %v829_v6  ;;  %v833_v23 = vrot.slane %v715_v60, 2 }
 0x1be   :  { %808 = vst [vmem:[%s1504_s3 + $0x18] sm:$0xff] %v804_v4  ;;  %v865_v32 = vsel %vm778_vm15, %v863_v48, %v821_v45  ;;  %v879_v49 = vsel %vm778_vm15, %v877_v31, %v845_v5  ;;  %v822_v1 = vrot.slane %v1399_v62, 5  ;;  %v857_v56 = vrot.slane %v715_v60, 4 }
 0x1bf   :  { %v867_v53 = vsel %vm511_vm4, %v865_v32, %v825_v24  ;;  %v881_v54 = vsel %vm511_vm4, %v879_v49, %v849_v61  ;;  %v846_v35 = vrot.slane %v1399_v62, 7  ;;  %v862_v43 = vsel %vm772_vm13, %v1007_v2, %v812_v27 }
 0x1c0   :  { %v869_v7 = vsel %vm553_vm9, %v867_v53, %v829_v6  ;;  %v883_v37 = vsel %vm553_vm9, %v881_v54, %v853_v55  ;;  %v876_v59 = vsel %vm772_vm13, %v838_v28, %v842_v17  ;;  %v864_v61 = vsel %vm775_vm14, %v862_v43, %v816_v34 }
 0x1c1   :  { %v871_v24 = vsel %vm785_vm0, %v869_v7, %v811_v50  ;;  %v885_v0 = vsel %vm785_vm0, %v883_v37, %v841_v25  ;;  %v878_v22 = vsel %vm775_vm14, %v876_v59, %v830_v39  ;;  %v866_v58 = vsel %vm778_vm15, %v864_v61, %v822_v1 }
 0x1c2   :  { %v873_v6 = vsel %vm788_vm1, %v871_v24, %v833_v23  ;;  %v887_v55 = vsel %vm788_vm1, %v885_v0, %v857_v56  ;;  %v880_v60 = vsel %vm778_vm15, %v878_v22, %v846_v35  ;;  %v868_v28 = vsel %vm511_vm4, %v866_v58, %v826_v16 }
 0x1c3   :  { %914 = vst [vmem:[%s1504_s3 + $0x20] sm:$0xff] %v873_v6  ;;  %916 = vst [vmem:[%s1504_s3 + $0x30] sm:$0xff] %v887_v55  ;;  %v882_v36 = vsel %vm511_vm4, %v880_v60, %v850_v44  ;;  %v834_v50 = vrot.slane %v1399_v62, 2  ;;  %v858_v25 = vrot.slane %v1399_v62, 4  ;;  %v870_v3 = vsel %vm553_vm9, %v868_v28, %v830_v39 }
 0x1c4   :  { %v884_v57 = vsel %vm553_vm9, %v882_v36, %v854_v40  ;;  %v872_v38 = vsel %vm785_vm0, %v870_v3, %v812_v27 }
 0x1c5   :  { %v886_v41 = vsel %vm785_vm0, %v884_v57, %v842_v17  ;;  %v874_v46 = vsel %vm788_vm1, %v872_v38, %v834_v50 }
 0x1c6   :  { %v888_v16 = vsel %vm788_vm1, %v886_v41, %v858_v25  ;;  %915 = vst [vmem:[%s1504_s3 + $0x28] sm:$0xff] %v874_v46 }
 0x1c7   :  { %917 = vst [vmem:[%s1504_s3 + $0x38] sm:$0xff] %v888_v16 }

</bundles_post_ra>
